<compile_context>
chip_gen: v7x
topology: tpu7x:2x2x1
jax: 0.10.0
libtpu: 0.0.40
codegen_flags: <defaults>
</compile_context>

<pallas_src>
import functools

import jax
import jax.numpy as jnp
from jax.experimental import pallas as pl
from jax.experimental.pallas import tpu as pltpu


def _round_up(x, m):
    return ((x + m - 1) // m) * m


def _gbdt_kernel(x_ref, featT_ref, thresh_ref, a_ref, mthresh_ref, leaf_ref, out_ref,
                 *, reduce_out):
    # x_ref:       (tile_b, n_in)   f32
    # featT_ref:   (n_in, TDp)      f32 one-hot feature selector (lane-padded)
    # thresh_ref:  (1, TDp)         f32 thresholds (+inf in padding -> padded bits == 0)
    # a_ref:       (TDp, TLp)       bf16 block-diag leaf-code matrix (values -1/0/+1)
    # mthresh_ref: (1, TLp)         f32 folded match threshold csum - 0.5 (+inf in padding)
    # leaf_ref:    (1, TLp) f32 leaf row (reduce path)  or  (TLp, n_out) f32 (matmul path)
    # out_ref:     (tile_b, n_out)  f32
    sel = jnp.dot(x_ref[...], featT_ref[...], preferred_element_type=jnp.float32)
    bits = (sel > thresh_ref[...]).astype(jnp.float32)                 # exact {0,1}
    score = jnp.dot(bits.astype(jnp.bfloat16), a_ref[...],
                    preferred_element_type=jnp.float32)                # integer-valued
    match = (score > mthresh_ref[...]).astype(jnp.float32)             # one-hot leaf / tree
    if reduce_out:
        out_ref[...] = jnp.sum(match * leaf_ref[...], axis=-1, keepdims=True)
    else:
        out_ref[...] = jnp.dot(match, leaf_ref[...], preferred_element_type=jnp.float32)


class Config:
    def __init__(self, n_in=16, n_out=1, estimators=8):
        self.n_in = n_in
        self.n_out = n_out
        self.estimators = estimators


class XGBoostPallas:
    """Pallas TPU implementation of the XGBoost module's forward (predict) pass.

    The ensemble (one oblivious tree per estimator, depth `depth`) is initialized
    deterministically from jax.random.PRNGKey(0).
    """

    def __init__(self, config, depth=3, key=None, tile_b=2048):
        self.n_in = config.n_in
        self.n_out = config.n_out
        self.estimators = config.estimators
        self.depth = depth
        self.tile_b = tile_b

        T, D, L = self.estimators, self.depth, 2 ** self.depth
        TD, TL = T * D, T * L
        self.n_leaves = L
        self.TDp = _round_up(TD, 128)
        self.TLp = _round_up(TL, 128)

        if key is None:
            key = jax.random.PRNGKey(0)
        k_feat, k_thr, k_leaf = jax.random.split(key, 3)

        # One split feature per (tree, level).
        feat_idx = jax.random.randint(k_feat, (TD,), 0, self.n_in)
        featT = jax.nn.one_hot(feat_idx, self.n_in, dtype=jnp.float32).T       # (n_in, TD)
        thresh = jax.random.normal(k_thr, (1, TD), dtype=jnp.float32)          # (1, TD)
        leaf_vals = 0.1 * jax.random.normal(k_leaf, (TL, self.n_out), dtype=jnp.float32)

        # Leaf bit codes: codes[l, d] = (l >> d) & 1.
        codes = ((jnp.arange(L)[:, None] >> jnp.arange(D)[None, :]) & 1).astype(jnp.float32)
        blk = (2.0 * codes - 1.0).T                                            # (D, L)
        A = jnp.zeros((TD, TL), dtype=jnp.float32)
        for t in range(T):
            A = A.at[t * D:(t + 1) * D, t * L:(t + 1) * L].set(blk)
        csum = jnp.tile(codes.sum(axis=1), (T,))[None, :]                      # (1, TL)

        # Unpadded copies for the pure-JAX reference.
        self.featT, self.thresh, self.A = featT, thresh, A
        self.csum, self.leaf_vals = csum, leaf_vals

        # Lane-padded, bias-folded kernel operands (built once on the host).
        self.featT_pad = jnp.zeros((self.n_in, self.TDp), jnp.float32).at[:, :TD].set(featT)
        self.thresh_pad = jnp.full((1, self.TDp), jnp.inf, jnp.float32).at[:, :TD].set(thresh)
        A_pad = jnp.zeros((self.TDp, self.TLp), jnp.float32).at[:TD, :TL].set(A)
        self.A_pad = A_pad.astype(jnp.bfloat16)  # {-1, 0, +1}: exact in bf16
        self.mthresh_pad = (jnp.full((1, self.TLp), jnp.inf, jnp.float32)
                            .at[:, :TL].set(csum - 0.5))
        if self.n_out == 1:
            self.leaf_pad = (jnp.zeros((1, self.TLp), jnp.float32)
                             .at[:, :TL].set(leaf_vals[:, 0][None, :]))
        else:
            self.leaf_pad = jnp.zeros((self.TLp, self.n_out), jnp.float32).at[:TL, :].set(leaf_vals)

        # TODO(synk): .fit() / walk-forward training, joblib checkpoint IO and plotting
        # have no Pallas equivalent; only the predict (forward) path is implemented.

    def _predict(self, X):
        X = jnp.asarray(X, dtype=jnp.float32)
        B = X.shape[0]
        n_in, n_out = self.n_in, self.n_out
        TDp, TLp = self.TDp, self.TLp

        tile_b = min(self.tile_b, _round_up(B, 8))
        Bp = _round_up(B, tile_b)
        if Bp != B:
            X = jnp.pad(X, ((0, Bp - B), (0, 0)))

        reduce_out = (n_out == 1)
        kernel = functools.partial(_gbdt_kernel, reduce_out=reduce_out)
        leaf_block = (1, TLp) if reduce_out else (TLp, n_out)

        # VMEM budget: double-buffered X/out tiles + f32 intermediates + weights + headroom.
        weights_bytes = (n_in * TDp + TDp + TDp * TLp + TLp + TLp * max(n_out, 1)) * 4
        est = (2 * tile_b * n_in * 4 + 2 * tile_b * n_out * 4
               + 3 * tile_b * (TDp + TLp) * 4 + weights_bytes + (8 << 20))
        vmem_limit = int(min(max(est, 16 << 20), 40 << 20))

        out = pl.pallas_call(
            kernel,
            out_shape=jax.ShapeDtypeStruct((Bp, n_out), jnp.float32),
            grid=(Bp // tile_b,),
            in_specs=[
                pl.BlockSpec((tile_b, n_in), lambda i: (i, 0)),   # X: streamed over B
                pl.BlockSpec((n_in, TDp), lambda i: (0, 0)),      # weights: resident
                pl.BlockSpec((1, TDp), lambda i: (0, 0)),
                pl.BlockSpec((TDp, TLp), lambda i: (0, 0)),
                pl.BlockSpec((1, TLp), lambda i: (0, 0)),
                pl.BlockSpec(leaf_block, lambda i: (0, 0)),
            ],
            out_specs=pl.BlockSpec((tile_b, n_out), lambda i: (i, 0)),
            compiler_params=pltpu.CompilerParams(
                dimension_semantics=("parallel",),
                vmem_limit_bytes=vmem_limit,
            ),
        )(X, self.featT_pad, self.thresh_pad, self.A_pad, self.mthresh_pad, self.leaf_pad)
        return out[:B]

    def _predict_ref(self, X):
        # Pure-JAX reference of the same ensemble (unpadded), used for correctness check.
        sel = jnp.asarray(X, jnp.float32) @ self.featT
        bits = (sel > self.thresh).astype(jnp.float32)
        count = self.depth - self.csum + bits @ self.A
        match = (count > self.depth - 0.5).astype(jnp.float32)
        return match @ self.leaf_vals

    def forward(self, X):
        # Mirrors the torch module: a 1-D feature vector is treated as a batch of one and
        # the single prediction is returned; XGBRegressor.predict returns (batch,) for
        # single-output regression, so the trailing dim is squeezed when n_out == 1.
        X = jnp.asarray(X)
        single = (X.ndim == 1)
        if single:
            X = X[None, :]
        y = self._predict(X)
        if self.n_out == 1:
            y = y[:, 0]
        return y[0] if single else y

    __call__ = forward


if __name__ == "__main__":
    cfg = Config(n_in=16, n_out=1, estimators=8)
    model = XGBoostPallas(cfg, depth=3, key=jax.random.PRNGKey(0))

    key = jax.random.PRNGKey(0)
    x_batch = jax.random.normal(jax.random.fold_in(key, 1), (8, cfg.n_in), dtype=jnp.float32)
    x_single = jax.random.normal(jax.random.fold_in(key, 2), (cfg.n_in,), dtype=jnp.float32)
    x_big = jax.random.normal(jax.random.fold_in(key, 3), (300, cfg.n_in), dtype=jnp.float32)

    y_batch = jax.block_until_ready(model(x_batch))     # shape (8,)
    y_single = jax.block_until_ready(model(x_single))   # scalar
    y_big = jax.block_until_ready(model(x_big))         # shape (300,), exercises padding

    assert y_batch.shape == (8,)
    assert y_single.shape == ()
    assert y_big.shape == (300,)

    # Sanity-check the kernel against the pure-JAX ensemble reference.
    ref_batch = model._predict_ref(x_batch)[:, 0]
    ref_big = model._predict_ref(x_big)[:, 0]
    assert jnp.allclose(y_batch, ref_batch, atol=1e-5), "kernel mismatch vs reference (batch)"
    assert jnp.allclose(y_big, ref_big, atol=1e-5), "kernel mismatch vs reference (big batch)"

    print("KERNEL_OK")
</pallas_src>

<mosaic_0001>
module attributes {stable_mosaic.version = 11 : i64} {
  func.func @_gbdt_kernel(%arg0: i32, %arg1: memref<8x16xf32, #tpu.memory_space<vmem>>, %arg2: memref<16x128xf32, #tpu.memory_space<vmem>>, %arg3: memref<1x128xf32, #tpu.memory_space<vmem>>, %arg4: memref<128x128xbf16, #tpu.memory_space<vmem>>, %arg5: memref<1x128xf32, #tpu.memory_space<vmem>>, %arg6: memref<1x128xf32, #tpu.memory_space<vmem>>, %arg7: memref<8x1xf32, #tpu.memory_space<vmem>>) attributes {dimension_semantics = [#tpu.dimension_semantics<parallel>], iteration_bounds = array<i64: 1>, scalar_prefetch = 0 : i64, scratch_operands = 0 : i64, tpu.core_type = #tpu.core_type<tc>, window_params = [{transform_indices = @transform_0, window_bounds = array<i64: 8, 16>}, {pipeline_mode = #tpu.pipeline_mode<synchronous>, transform_indices = @transform_1, window_bounds = array<i64: 16, 128>}, {pipeline_mode = #tpu.pipeline_mode<synchronous>, transform_indices = @transform_2, window_bounds = array<i64: 1, 128>}, {pipeline_mode = #tpu.pipeline_mode<synchronous>, transform_indices = @transform_3, window_bounds = array<i64: 128, 128>}, {pipeline_mode = #tpu.pipeline_mode<synchronous>, transform_indices = @transform_4, window_bounds = array<i64: 1, 128>}, {pipeline_mode = #tpu.pipeline_mode<synchronous>, transform_indices = @transform_5, window_bounds = array<i64: 1, 128>}, {transform_indices = @transform_6, window_bounds = array<i64: 8, 1>}]} {
    %c0 = arith.constant 0 : index
    %c0_0 = arith.constant 0 : index
    %0 = vector.load %arg1[%c0, %c0_0] : memref<8x16xf32, #tpu.memory_space<vmem>>, vector<8x16xf32>
    %c0_1 = arith.constant 0 : index
    %c0_2 = arith.constant 0 : index
    %1 = vector.load %arg2[%c0_1, %c0_2] : memref<16x128xf32, #tpu.memory_space<vmem>>, vector<16x128xf32>
    %cst = arith.constant dense<0.000000e+00> : vector<8x128xf32>
    %2 = tpu.matmul %0, %1, %cst {dimension_numbers = #tpu.dot_dimension_numbers<[1], [0], [0], [1], [0, 0, 1, 1], [], []>} : vector<8x16xf32>, vector<16x128xf32>, vector<8x128xf32> -> vector<8x128xf32>
    %c0_3 = arith.constant 0 : index
    %c0_4 = arith.constant 0 : index
    %3 = vector.load %arg3[%c0_3, %c0_4] : memref<1x128xf32, #tpu.memory_space<vmem>>, vector<1x128xf32>
    %4 = vector.broadcast %3 : vector<1x128xf32> to vector<8x128xf32>
    %5 = arith.cmpf ogt, %2, %4 : vector<8x128xf32>
    %6 = arith.extui %5 : vector<8x128xi1> to vector<8x128xi32>
    %7 = arith.sitofp %6 : vector<8x128xi32> to vector<8x128xf32>
    %8 = arith.truncf %7 : vector<8x128xf32> to vector<8x128xbf16>
    %c0_5 = arith.constant 0 : index
    %c0_6 = arith.constant 0 : index
    %9 = vector.load %arg4[%c0_5, %c0_6] : memref<128x128xbf16, #tpu.memory_space<vmem>>, vector<128x128xbf16>
    %cst_7 = arith.constant dense<0.000000e+00> : vector<8x128xf32>
    %10 = tpu.matmul %8, %9, %cst_7 {dimension_numbers = #tpu.dot_dimension_numbers<[1], [0], [0], [1], [0, 0, 1, 1], [], []>} : vector<8x128xbf16>, vector<128x128xbf16>, vector<8x128xf32> -> vector<8x128xf32>
    %c0_8 = arith.constant 0 : index
    %c0_9 = arith.constant 0 : index
    %11 = vector.load %arg5[%c0_8, %c0_9] : memref<1x128xf32, #tpu.memory_space<vmem>>, vector<1x128xf32>
    %12 = vector.broadcast %11 : vector<1x128xf32> to vector<8x128xf32>
    %13 = arith.cmpf ogt, %10, %12 : vector<8x128xf32>
    %14 = arith.extui %13 : vector<8x128xi1> to vector<8x128xi32>
    %15 = arith.sitofp %14 : vector<8x128xi32> to vector<8x128xf32>
    %c0_10 = arith.constant 0 : index
    %c0_11 = arith.constant 0 : index
    %16 = vector.load %arg6[%c0_10, %c0_11] : memref<1x128xf32, #tpu.memory_space<vmem>>, vector<1x128xf32>
    %17 = vector.broadcast %16 : vector<1x128xf32> to vector<8x128xf32>
    %18 = arith.mulf %15, %17 : vector<8x128xf32>
    %cst_12 = arith.constant dense<0.000000e+00> : vector<8xf32>
    %19 = vector.multi_reduction <add>, %18, %cst_12 [1] : vector<8x128xf32> to vector<8xf32>
    %20 = vector.shape_cast %19 : vector<8xf32> to vector<8x1xf32>
    %c0_13 = arith.constant 0 : index
    %c0_14 = arith.constant 0 : index
    %21 = vector.load %arg7[%c0_13, %c0_14] : memref<8x1xf32, #tpu.memory_space<vmem>>, vector<8x1xf32>
    tpu.vector_store %arg7[%c0_13, %c0_14], %20 {strides = array<i32>} : memref<8x1xf32, #tpu.memory_space<vmem>>, vector<8x1xf32>,
    return
  }
  func.func @transform_0(%arg0: i32) -> (i32, i32) {
    %c0_i32 = arith.constant 0 : i32
    %c0_i32_0 = arith.constant 0 : i32
    return %arg0, %c0_i32 : i32, i32
  }
  func.func @transform_1(%arg0: i32) -> (i32, i32) {
    %c0_i32 = arith.constant 0 : i32
    %c0_i32_0 = arith.constant 0 : i32
    %c0_i32_1 = arith.constant 0 : i32
    return %c0_i32, %c0_i32_0 : i32, i32
  }
  func.func @transform_2(%arg0: i32) -> (i32, i32) {
    %c0_i32 = arith.constant 0 : i32
    %c0_i32_0 = arith.constant 0 : i32
    %c0_i32_1 = arith.constant 0 : i32
    return %c0_i32, %c0_i32_0 : i32, i32
  }
  func.func @transform_3(%arg0: i32) -> (i32, i32) {
    %c0_i32 = arith.constant 0 : i32
    %c0_i32_0 = arith.constant 0 : i32
    %c0_i32_1 = arith.constant 0 : i32
    return %c0_i32, %c0_i32_0 : i32, i32
  }
  func.func @transform_4(%arg0: i32) -> (i32, i32) {
    %c0_i32 = arith.constant 0 : i32
    %c0_i32_0 = arith.constant 0 : i32
    %c0_i32_1 = arith.constant 0 : i32
    return %c0_i32, %c0_i32_0 : i32, i32
  }
  func.func @transform_5(%arg0: i32) -> (i32, i32) {
    %c0_i32 = arith.constant 0 : i32
    %c0_i32_0 = arith.constant 0 : i32
    %c0_i32_1 = arith.constant 0 : i32
    return %c0_i32, %c0_i32_0 : i32, i32
  }
  func.func @transform_6(%arg0: i32) -> (i32, i32) {
    %c0_i32 = arith.constant 0 : i32
    %c0_i32_0 = arith.constant 0 : i32
    return %arg0, %c0_i32 : i32, i32
  }
}

</mosaic_0001>

<bundles_post_ra>
// kernel: tpu_custom_call.1
= control target key start
LH: loop header
LB: loop body
LE: loop exit
PB: predicated region body
PF: predicated region fallthrough
CT: control target
= control target key end

     0   :  { %11 = vsyncpa [#allocation3], 0  ;;  %s524_s0 = inlined_call_operand.hbm [shape: f32[8,16], index: 0, kind: input, shape index: {}]   ;;  %s525_s1 = inlined_call_operand.hbm [shape: f32[16,128], index: 1, kind: input, shape index: {}]   ;;  %s526_s2 = inlined_call_operand.vmem [shape: f32[1,128], index: 2, kind: input, shape index: {}]   ;;  %s527_s3 = inlined_call_operand.hbm [shape: bf16[128,128], index: 3, kind: input, shape index: {}]   ;;  %s528_s4 = inlined_call_operand.vmem [shape: f32[1,128], index: 4, kind: input, shape index: {}]   ;;  %s529_s5 = inlined_call_operand.vmem [shape: f32[1,128], index: 5, kind: input, shape index: {}]   ;;  %s530_s6 = inlined_call_operand.vmem [shape: f32[8,1], index: 6, kind: output, shape index: {}]  }
   0x1   :  { %12 = vsyncpa [#allocation5], 0  ;;  %s430_s21 = smov [#allocation4]   ;;  %s360_s25 = scalar_lea.hbm %s525_s1, 256 }
   0x2   :  { %s28_s22 = sshll.u32 %s430_s21, 4  ;;  %p361_p0 = scmp.ne.s32.totalorder %s525_s1, %s360_s25  ;;  %s29_s22 = int_to_ptr.vmem [resolvable:$true] %s28_s22 }
   0x3   :  { %p364_p1 = scmp.lt.u32.totalorder %s360_s25, %s525_s1 }
   0x5   :  { %p366_p2 = pnand %p364_p1, %p361_p0 }
   0x7   :  { %369 = shalt.err (!%p366_p2)
}
   0x8   :  { %s370_s30 = scalar_lea.vmem %s29_s22, 256  ;;  %p375_p4 = scmp.lt.s32.totalorder %s29_s22, %s29_s22 }
   0x9   :  { %p371_p3 = scmp.ne.s32.totalorder %s29_s22, %s370_s30  ;;  %p376_p5 = scmp.lt.s32.totalorder %s370_s30, %s370_s30 }
   0xb   :  { %p377_p6 = por %p376_p5, %p375_p4 }
   0xd   :  { %p378_p7 = pnand %p377_p6, %p371_p3 }
   0xf   :  { %381 = shalt.err (!%p378_p7)
}
  0x10   :  { %s431_s7 = smov 128   ;;  %s432_s8 = smov 8  }
  0x11   :  { %34 = dma.hbm_to_vmem [thread:$0]  %s525_s1, 256, %s29_s22, [#allocation5], %s431_s7, %s431_s7, %s432_s8  }
  0x12   :  { %s433_s11 = smov [#allocation2]   ;;  %s434_s13 = smov [#allocation6]  }
  0x13   :  { %s19_s12 = sshll.u32 %s433_s11, 4  ;;  %s42_s14 = sshll.u32 %s434_s13, 4  ;;  %s20_s12 = int_to_ptr.vmem [resolvable:$true] %s19_s12  ;;  %s43_s14 = int_to_ptr.vmem [resolvable:$true] %s42_s14 }
  0x14   :  { %s382_s17 = scalar_lea.hbm %s524_s0, 128 }
  0x15   :  { %p383_p8 = scmp.ne.s32.totalorder %s524_s0, %s382_s17  ;;  %p386_p9 = scmp.lt.u32.totalorder %s382_s17, %s524_s0 }
  0x17   :  { %p388_p10 = pnand %p386_p9, %p383_p8 }
  0x19   :  { %391 = shalt.err (!%p388_p10)
}
  0x1a   :  { %s392_s1 = scalar_lea.vmem %s20_s12, 128  ;;  %p397_p12 = scmp.lt.s32.totalorder %s20_s12, %s20_s12 }
  0x1b   :  { %p393_p11 = scmp.ne.s32.totalorder %s20_s12, %s392_s1  ;;  %p398_p13 = scmp.lt.s32.totalorder %s392_s1, %s392_s1 }
  0x1d   :  { %p399_p0 = por %p398_p13, %p397_p12 }
  0x1f   :  { %p400_p1 = pnand %p399_p0, %p393_p11 }
  0x21   :  { %403 = shalt.err (!%p400_p1)
}
  0x22   :  { %22 = dma.hbm_to_vmem [thread:$0]  %s524_s0, 128, %s20_s12, [#allocation3]  }
  0x23   :  { %s404_s26 = scalar_lea.hbm %s527_s3, 1024 }
  0x24   :  { %p405_p2 = scmp.ne.s32.totalorder %s527_s3, %s404_s26  ;;  %p408_p3 = scmp.lt.u32.totalorder %s404_s26, %s527_s3 }
  0x26   :  { %p410_p4 = pnand %p408_p3, %p405_p2 }
  0x28   :  { %413 = shalt.err (!%p410_p4)
}
  0x29   :  { %s414_s7 = scalar_lea.vmem %s43_s14, 1024  ;;  %p419_p6 = scmp.lt.s32.totalorder %s43_s14, %s43_s14 }
  0x2a   :  { %p415_p5 = scmp.ne.s32.totalorder %s43_s14, %s414_s7  ;;  %p420_p7 = scmp.lt.s32.totalorder %s414_s7, %s414_s7 }
  0x2c   :  { %p421_p8 = por %p420_p7, %p419_p6 }
  0x2e   :  { %p422_p9 = pnand %p421_p8, %p415_p5 }
  0x30   :  { %425 = shalt.err (!%p422_p9)
}
  0x31   :  { %s435_s0 = smov 64   ;;  %s436_s8 = smov 4  }
  0x32   :  { %48 = dma.hbm_to_vmem [thread:$0]  %s527_s3, 1024, %s43_s14, [#allocation5], %s435_s0, %s435_s0, %s436_s8  }
  0x33   :  { %426 = dma.done.wait [#allocation3], 128  }
  0x34   :  { %427 = vsyncadd [#allocation3], 4294967168 }
  0x35   :  { %428 = dma.done.wait [#allocation5], 1280  }
  0x36   :  { %429 = vsyncadd [#allocation5], 4294966016  ;;  %v437_v0 = vmov 0.0|0.0   ;;  %vm438_vm0 = vmmov 0   ;;  %v439_v1 = vmov 0.0   ;;  %v64_v2 = vld [vmem:[#allocation4] sm:$0xff] }
  0x37   :  { %338 = vmatprep.subr.bf16.mxu0 %v437_v0  ;;  %315 = vmatprep.mubr.msk.f32.mxu0 %vm438_vm0, %v439_v1  ;;  %v65_v3 = vld [vmem:[#allocation4 + $0x8] sm:$0xff]  ;;  %v352_v5 = vld [vmem:[#allocation6] sm:$0xff]   ;;  %v63_v6 = vld [vmem:[#allocation2] sm:$0xff]  ;;  %vm66_vm1 = vcmask 130048   ;;  %v440_v17 = vmov 1.0|1.0  }
  0x38   :  { %318 = vmatprep.subr.bf16.mxu1 %v439_v1  ;;  %334 = vmatprep.mubr.msk.bf16.mxu1 %vm438_vm0, %v439_v1  ;;  %v339_v4 = vpack.c.bf16 %v65_v3, %v64_v2  ;;  %v353_v7 = vld [vmem:[#allocation6 + $0x8] sm:$0xff]   ;;  %v354_v8 = vld [vmem:[#allocation6 + $0x10] sm:$0xff]   ;;  %v355_v9 = vld [vmem:[#allocation6 + $0x18] sm:$0xff]   ;;  %vm275_vm5 = vcmask 7168  }
  0x39   :  { %319 = vmatpush3.bf16.msra.mxu1 %v352_v5  ;;  %v356_v10 = vld [vmem:[#allocation6 + $0x20] sm:$0xff]   ;;  %v357_v11 = vld [vmem:[#allocation6 + $0x28] sm:$0xff]   ;;  %v358_v12 = vld [vmem:[#allocation6 + $0x30] sm:$0xff]  }
  0x3a   :  { %340 = vmatpush3.bf16.msra.mxu0 %v339_v4  ;;  %320 = vmatprep.subr.bf16.mxu1 %v439_v1  ;;  %v359_v13 = vld [vmem:[#allocation6 + $0x38] sm:$0xff]   ;;  %v284_v14 = vld [vmem:[%s526_s2] ss:$0 sm:$0xff] }
  0x3b   :  { %v296_v18 = vld [vmem:[%s528_s4] ss:$0 sm:$0xff] }
  0x3c   :  { %v298_v20 = vld [vmem:[%s529_s5] ss:$0 sm:$0xff] }
  0x3d   :  { %316 = vmatmul.mubr.msk.f32.vlgmr.msra.gmra.mrb[0].mxu0 %vm66_vm1, %v63_v6  ;;  %321 = vmatpush3.bf16.msra.mxu1 %v353_v7 }
  0x3e   :  { %322 = vmatprep.subr.bf16.mxu1 %v439_v1 }
  0x41   :  { %323 = vmatpush3.bf16.msra.mxu1 %v354_v8 }
  0x42   :  { %324 = vmatprep.subr.bf16.mxu1 %v439_v1 }
  0x45   :  { %325 = vmatpush3.bf16.msra.mxu1 %v355_v9 }
  0x46   :  { %326 = vmatprep.subr.bf16.mxu1 %v439_v1 }
  0x49   :  { %327 = vmatpush3.bf16.msra.mxu1 %v356_v10 }
  0x4a   :  { %328 = vmatprep.subr.bf16.mxu1 %v439_v1 }
  0x4d   :  { %329 = vmatpush3.bf16.msra.mxu1 %v357_v11 }
  0x4e   :  { %330 = vmatprep.subr.bf16.mxu1 %v439_v1 }
  0x51   :  { %331 = vmatpush3.bf16.msra.mxu1 %v358_v12 }
  0x52   :  { %332 = vmatprep.subr.bf16.mxu1 %v439_v1 }
  0x55   :  { %333 = vmatpush3.bf16.msra.mxu1 %v359_v13 }
 0x110   :  { %v136_v15 = vpop.f32.mrb[0].mxu0 }
 0x111   :  { %vm147_vm2 = vcmp.gt.f32.partialorder %v136_v15, %v284_v14  ;;  %v317_v16 = vpop.f32.mrb[1].mxu0 }
 0x112   :  { %vm294_vm3 = vmpackc.low %vm147_vm2, %vm147_vm2 }
 0x113   :  { %335 = vmatmul.mubr.msk.bf16.vlgmr.msra.gmra.mrb[0].mxu1 %vm294_vm3, %v440_v17 }
 0x1e6   :  { %v249_v19 = vpop.f32.mrb[0].mxu1 }
 0x1e7   :  { %vm262_vm4 = vcmp.gt.f32.partialorder %v249_v19, %v296_v18  ;;  %v336_v21 = vpop.f32.mrb[1].mxu1 }
 0x1e8   :  { %v252_v22 = vpop.f32.mrb[2].mxu1  ;;  %v297_v23 = vsel %vm262_vm4, 1.0, %v439_v1 }
 0x1e9   :  { %v337_v24 = vpop.f32.mrb[3].mxu1  ;;  %v272_v25 = vmul.f32 %v298_v20, %v297_v23 }
 0x1eb   :  { %273 = vadd.xlane.f32.xlu0 %v272_v25 }
 0x278   :  { %v274_v26 = vpop.xlane.xlu0 %273 }
 0x279   :  { %276 = vst.msk [vmem:[%s530_s6] sm:$0xff] %vm275_vm5, %v274_v26 }
 0x27a   :  { %281 = vsyncpa [#allocation3], 1 }
 0x27b   :  { %282 = vsyncpa [#allocation5], 1 }

</bundles_post_ra>
